<compile_context>
chip_gen: v7x
topology: tpu7x:2x2x1
jax: 0.10.0
libtpu: 0.0.40
codegen_flags: <defaults>
</compile_context>

<pallas_src>
import jax
import jax.numpy as jnp
from jax import lax
from jax.experimental import pallas as pl
from jax.experimental.pallas import tpu as pltpu


def _round_up(a, m):
    return (a + m - 1) // m * m


def mlp_kernel(x_ref, w1_ref, b1_ref, w2_ref, b2_ref, w3_ref, b3_ref, o_ref):
    """Feature-major MLP tile: activations are (features, TB) so every matmul is a natural MXU
    matmul and the final projection emits a lane-dense (1, TB) row."""
    x = x_ref[...].astype(jnp.bfloat16)                        # (TB, In), cast for the bf16 MXU
    # fc1: (64, In) . (TB, In) contracted over In -> (64, TB)   h1[o,b] = sum_i W1[o,i] * x[b,i]
    h1 = lax.dot_general(
        w1_ref[...], x,
        dimension_numbers=(((1,), (1,)), ((), ())),
        preferred_element_type=jnp.float32,
    )
    h1 = jnp.maximum(h1 + b1_ref[...], 0.0).astype(jnp.bfloat16)   # f32 epilogue, (64,1) bias col
    # fc2: (64, 64) @ (64, TB) -> (64, TB)   natural matmul
    h2 = lax.dot_general(
        w2_ref[...], h1,
        dimension_numbers=(((1,), (0,)), ((), ())),
        preferred_element_type=jnp.float32,
    )
    h2 = jnp.maximum(h2 + b2_ref[...], 0.0).astype(jnp.bfloat16)
    # fc3: (1, 64) @ (64, TB) -> (1, TB)   lane-dense output row, no transpose anywhere
    y = lax.dot_general(
        w3_ref[...], h2,
        dimension_numbers=(((1,), (0,)), ((), ())),
        preferred_element_type=jnp.float32,
    )
    o_ref[...] = (y + b3_ref[0, 0]).astype(o_ref.dtype)


_VMEM_BUDGET = 40 * 1024 * 1024     # planning budget used when picking TB
_VMEM_LIMIT = 48 * 1024 * 1024      # explicit scoped-VMEM limit handed to Mosaic (< v7x 64 MiB)


def _vmem_estimate(tb, n_in):
    lane_in = _round_up(n_in, 128)
    x_bufs = 2 * tb * lane_in * 4            # double-buffered, lane-padded f32 x tiles
    out_bufs = 2 * 8 * tb * 4                # (1, TB) f32 out tiles, sublane-padded to 8
    temps = 10 * tb * 64 * 4                 # h1/h2 f32 + bf16 copies + padded bf16 x (upper bound)
    return x_bufs + out_bufs + temps + (1 << 20)


def _choose_tile(batch, n_in, block_rows):
    b128 = _round_up(batch, 128)
    if b128 >= 256:
        # at least 2 grid steps: feeds both v7x TensorCores and keeps the DMA pipeline busy
        tb = min(block_rows, _round_up(-(-b128 // 2), 128))
    else:
        tb = b128
    tb = max(128, _round_up(tb, 128))
    while _vmem_estimate(tb, n_in) > _VMEM_BUDGET and tb > 256:
        tb = max(128, _round_up(tb // 2, 128))
    return tb


def heart_rate_model(x, params, *, block_rows=8192):
    """x: (B, input_size) float32. Returns (B, 1) float32 == PyTorch HeartRateModel.forward."""
    B, In = x.shape
    # Weights to bf16 for the MXU (tiny arrays, negligible cost); biases stay f32.
    w1 = params["w1"].astype(jnp.bfloat16)
    w2 = params["w2"].astype(jnp.bfloat16)
    w3 = params["w3"].astype(jnp.bfloat16)
    b1, b2, b3 = params["b1"], params["b2"], params["b3"]

    TB = _choose_tile(B, In, block_rows)
    B_pad = _round_up(B, TB)
    G = B_pad // TB
    if B_pad != B:
        # Padded rows compute garbage and are sliced off below (at most TB-1 dead rows).
        x = jnp.pad(x, ((0, B_pad - B), (0, 0)))

    weight_bytes = 2 * (64 * In + 64 * 64 + 64) + 4 * (64 + 64 + 1)
    cost = pl.CostEstimate(
        flops=2 * B_pad * (In * 64 + 64 * 64 + 64),
        transcendentals=0,
        bytes_accessed=B_pad * In * 4 + B_pad * 4 + weight_bytes,
    )

    const = lambda i: (0, 0)  # weights/biases: same block every step -> stay resident in VMEM

    out = pl.pallas_call(
        mlp_kernel,
        out_shape=jax.ShapeDtypeStruct((G, TB), jnp.float32),
        grid=(G,),
        in_specs=[
            pl.BlockSpec((TB, In), lambda i: (i, 0)),           # x: batch-tiled, double-buffered
            pl.BlockSpec((64, In), const),                      # w1 (out, in)
            pl.BlockSpec((64, 1), const),                       # b1 column
            pl.BlockSpec((64, 64), const),                      # w2 (out, in)
            pl.BlockSpec((64, 1), const),                       # b2 column
            pl.BlockSpec((1, 64), const),                       # w3 (out, in)
            pl.BlockSpec(memory_space=pltpu.MemorySpace.SMEM),  # b3 scalar in SMEM
        ],
        out_specs=pl.BlockSpec((1, TB), lambda i: (i, 0)),      # lane-dense output row per tile
        compiler_params=pltpu.CompilerParams(
            dimension_semantics=("parallel",),
            vmem_limit_bytes=_VMEM_LIMIT,
        ),
        cost_estimate=cost,
    )(x, w1, b1, w2, b2, w3, b3)

    # (G, TB) -> (B_pad,) in batch order -> (B, 1)
    return out.reshape(-1)[:B].reshape(B, 1)


def init_params(key, input_size):
    """Deterministic init mirroring nn.Linear: weights (out, in), biases stored as (out, 1)."""
    k1, k2, k3, k4, k5, k6 = jax.random.split(key, 6)

    def linear(kw, kb, fan_in, fan_out):
        bound = 1.0 / jnp.sqrt(jnp.float32(fan_in))
        w = jax.random.uniform(kw, (fan_out, fan_in), jnp.float32, -bound, bound)
        b = jax.random.uniform(kb, (fan_out, 1), jnp.float32, -bound, bound)
        return w, b

    w1, b1 = linear(k1, k2, input_size, 64)
    w2, b2 = linear(k3, k4, 64, 64)
    w3, b3 = linear(k5, k6, 64, 1)
    return {"w1": w1, "b1": b1, "w2": w2, "b2": b2, "w3": w3, "b3": b3}


def reference(x, p):
    h1 = jnp.maximum(x @ p["w1"].T + p["b1"][:, 0], 0.0)
    h2 = jnp.maximum(h1 @ p["w2"].T + p["b2"][:, 0], 0.0)
    return h2 @ p["w3"].T + p["b3"].T


if __name__ == "__main__":
    key = jax.random.PRNGKey(0)
    kx, kp = jax.random.split(key)

    batch, input_size = 8, 16  # input_size plays the role of X_train.shape[1]
    x = jax.random.normal(kx, (batch, input_size), jnp.float32)
    params = init_params(kp, input_size)

    out = heart_rate_model(x, params)
    jax.block_until_ready(out)

    ref = reference(x, params)
    assert out.shape == (batch, 1)
    # bf16 MXU inputs with f32 accumulation: loosened tolerance vs the f32 reference.
    assert jnp.allclose(out, ref, atol=3e-2, rtol=3e-2)

    print("KERNEL_OK")
</pallas_src>

<mosaic_0001>
module attributes {stable_mosaic.version = 11 : i64} {
  func.func @mlp_kernel(%arg0: i32, %arg1: memref<128x16xf32, #tpu.memory_space<vmem>>, %arg2: memref<64x16xbf16, #tpu.memory_space<vmem>>, %arg3: memref<64x1xf32, #tpu.memory_space<vmem>>, %arg4: memref<64x64xbf16, #tpu.memory_space<vmem>>, %arg5: memref<64x1xf32, #tpu.memory_space<vmem>>, %arg6: memref<1x64xbf16, #tpu.memory_space<vmem>>, %arg7: memref<1x1xf32, #tpu.memory_space<smem>>, %arg8: memref<1x128xf32, #tpu.memory_space<vmem>>) attributes {dimension_semantics = [#tpu.dimension_semantics<parallel>], iteration_bounds = array<i64: 1>, scalar_prefetch = 0 : i64, scratch_operands = 0 : i64, tpu.core_type = #tpu.core_type<tc>, window_params = [{transform_indices = @transform_0, window_bounds = array<i64: 128, 16>}, {pipeline_mode = #tpu.pipeline_mode<synchronous>, transform_indices = @transform_1, window_bounds = array<i64: 64, 16>}, {pipeline_mode = #tpu.pipeline_mode<synchronous>, transform_indices = @transform_2, window_bounds = array<i64: 64, 1>}, {pipeline_mode = #tpu.pipeline_mode<synchronous>, transform_indices = @transform_3, window_bounds = array<i64: 64, 64>}, {pipeline_mode = #tpu.pipeline_mode<synchronous>, transform_indices = @transform_4, window_bounds = array<i64: 64, 1>}, {pipeline_mode = #tpu.pipeline_mode<synchronous>, transform_indices = @transform_5, window_bounds = array<i64: 1, 64>}, {transform_indices = @transform_6, window_bounds = array<i64: 1, 1>}, {transform_indices = @transform_7, window_bounds = array<i64: 1, 128>}]} {
    %c0 = arith.constant 0 : index
    %c0_0 = arith.constant 0 : index
    %0 = vector.load %arg1[%c0, %c0_0] : memref<128x16xf32, #tpu.memory_space<vmem>>, vector<128x16xf32>
    %1 = arith.truncf %0 : vector<128x16xf32> to vector<128x16xbf16>
    %c0_1 = arith.constant 0 : index
    %c0_2 = arith.constant 0 : index
    %2 = vector.load %arg2[%c0_1, %c0_2] : memref<64x16xbf16, #tpu.memory_space<vmem>>, vector<64x16xbf16>
    %cst = arith.constant dense<0.000000e+00> : vector<64x128xf32>
    %3 = tpu.matmul %2, %1, %cst {dimension_numbers = #tpu.dot_dimension_numbers<[1], [1], [0], [0], [0, 0, 1, 0], [], []>} : vector<64x16xbf16>, vector<128x16xbf16>, vector<64x128xf32> -> vector<64x128xf32>
    %c0_3 = arith.constant 0 : index
    %c0_4 = arith.constant 0 : index
    %4 = vector.load %arg3[%c0_3, %c0_4] : memref<64x1xf32, #tpu.memory_space<vmem>>, vector<64x1xf32>
    %5 = vector.broadcast %4 : vector<64x1xf32> to vector<64x128xf32>
    %6 = arith.addf %3, %5 : vector<64x128xf32>
    %cst_5 = arith.constant 0.000000e+00 : f32
    %7 = vector.broadcast %cst_5 : f32 to vector<64x128xf32>
    %8 = arith.maximumf %6, %7 : vector<64x128xf32>
    %9 = arith.truncf %8 : vector<64x128xf32> to vector<64x128xbf16>
    %c0_6 = arith.constant 0 : index
    %c0_7 = arith.constant 0 : index
    %10 = vector.load %arg4[%c0_6, %c0_7] : memref<64x64xbf16, #tpu.memory_space<vmem>>, vector<64x64xbf16>
    %cst_8 = arith.constant dense<0.000000e+00> : vector<64x128xf32>
    %11 = tpu.matmul %10, %9, %cst_8 {dimension_numbers = #tpu.dot_dimension_numbers<[1], [0], [0], [1], [0, 0, 1, 1], [], []>} : vector<64x64xbf16>, vector<64x128xbf16>, vector<64x128xf32> -> vector<64x128xf32>
    %c0_9 = arith.constant 0 : index
    %c0_10 = arith.constant 0 : index
    %12 = vector.load %arg5[%c0_9, %c0_10] : memref<64x1xf32, #tpu.memory_space<vmem>>, vector<64x1xf32>
    %13 = vector.broadcast %12 : vector<64x1xf32> to vector<64x128xf32>
    %14 = arith.addf %11, %13 : vector<64x128xf32>
    %cst_11 = arith.constant 0.000000e+00 : f32
    %15 = vector.broadcast %cst_11 : f32 to vector<64x128xf32>
    %16 = arith.maximumf %14, %15 : vector<64x128xf32>
    %17 = arith.truncf %16 : vector<64x128xf32> to vector<64x128xbf16>
    %c0_12 = arith.constant 0 : index
    %c0_13 = arith.constant 0 : index
    %18 = vector.load %arg6[%c0_12, %c0_13] : memref<1x64xbf16, #tpu.memory_space<vmem>>, vector<1x64xbf16>
    %cst_14 = arith.constant dense<0.000000e+00> : vector<1x128xf32>
    %19 = tpu.matmul %18, %17, %cst_14 {dimension_numbers = #tpu.dot_dimension_numbers<[1], [0], [0], [1], [0, 0, 1, 1], [], []>} : vector<1x64xbf16>, vector<64x128xbf16>, vector<1x128xf32> -> vector<1x128xf32>
    %c0_15 = arith.constant 0 : index
    %c0_16 = arith.constant 0 : index
    %20 = memref.load %arg7[%c0_15, %c0_16] : memref<1x1xf32, #tpu.memory_space<smem>>
    %21 = vector.broadcast %20 : f32 to vector<1x128xf32>
    %22 = arith.addf %19, %21 : vector<1x128xf32>
    %c0_17 = arith.constant 0 : index
    %c0_18 = arith.constant 0 : index
    %23 = vector.load %arg8[%c0_17, %c0_18] : memref<1x128xf32, #tpu.memory_space<vmem>>, vector<1x128xf32>
    tpu.vector_store %arg8[%c0_17, %c0_18], %22 {strides = array<i32>} : memref<1x128xf32, #tpu.memory_space<vmem>>, vector<1x128xf32>,
    return
  }
  func.func @transform_0(%arg0: i32) -> (i32, i32) {
    %c0_i32 = arith.constant 0 : i32
    %c0_i32_0 = arith.constant 0 : i32
    return %arg0, %c0_i32 : i32, i32
  }
  func.func @transform_1(%arg0: i32) -> (i32, i32) {
    %c0_i32 = arith.constant 0 : i32
    %c0_i32_0 = arith.constant 0 : i32
    %c0_i32_1 = arith.constant 0 : i32
    return %c0_i32, %c0_i32_0 : i32, i32
  }
  func.func @transform_2(%arg0: i32) -> (i32, i32) {
    %c0_i32 = arith.constant 0 : i32
    %c0_i32_0 = arith.constant 0 : i32
    %c0_i32_1 = arith.constant 0 : i32
    return %c0_i32, %c0_i32_0 : i32, i32
  }
  func.func @transform_3(%arg0: i32) -> (i32, i32) {
    %c0_i32 = arith.constant 0 : i32
    %c0_i32_0 = arith.constant 0 : i32
    %c0_i32_1 = arith.constant 0 : i32
    return %c0_i32, %c0_i32_0 : i32, i32
  }
  func.func @transform_4(%arg0: i32) -> (i32, i32) {
    %c0_i32 = arith.constant 0 : i32
    %c0_i32_0 = arith.constant 0 : i32
    %c0_i32_1 = arith.constant 0 : i32
    return %c0_i32, %c0_i32_0 : i32, i32
  }
  func.func @transform_5(%arg0: i32) -> (i32, i32) {
    %c0_i32 = arith.constant 0 : i32
    %c0_i32_0 = arith.constant 0 : i32
    %c0_i32_1 = arith.constant 0 : i32
    return %c0_i32, %c0_i32_0 : i32, i32
  }
  func.func @transform_6(%arg0: i32) -> (i32, i32) {
    %c0_i32 = arith.constant 0 : i32
    %c0_i32_0 = arith.constant 0 : i32
    %c0_i32_1 = arith.constant 0 : i32
    return %c0_i32, %c0_i32_0 : i32, i32
  }
  func.func @transform_7(%arg0: i32) -> (i32, i32) {
    %c0_i32 = arith.constant 0 : i32
    %c0_i32_0 = arith.constant 0 : i32
    return %arg0, %c0_i32 : i32, i32
  }
}

</mosaic_0001>

<bundles_post_ra>
// kernel: tpu_custom_call.1
= control target key start
LH: loop header
LB: loop body
LE: loop exit
PB: predicated region body
PF: predicated region fallthrough
CT: control target
= control target key end

     0   :  { %vm129_vm0 = vcmask 130048   ;;  %v610_v5 = vmov 0   ;;  %s817_s0 = inlined_call_operand.vmem [shape: f32[128,16], index: 0, kind: input, shape index: {}]   ;;  %s818_s1 = inlined_call_operand.vmem [shape: bf16[64,16], index: 1, kind: input, shape index: {}]   ;;  %s819_s2 = inlined_call_operand.vmem [shape: f32[64,1], index: 2, kind: input, shape index: {}]   ;;  %s820_s3 = inlined_call_operand.vmem [shape: bf16[64,64], index: 3, kind: input, shape index: {}]   ;;  %s821_s4 = inlined_call_operand.vmem [shape: f32[64,1], index: 4, kind: input, shape index: {}]   ;;  %s822_s5 = inlined_call_operand.vmem [shape: bf16[1,64], index: 5, kind: input, shape index: {}]   ;;  %s823_s6 = inlined_call_operand.<no memory space> [shape: f32[1,1], index: 6, kind: input, shape index: {}]   ;;  %s824_s7 = inlined_call_operand.hbm [shape: f32[1,128], index: 7, kind: output, shape index: {}]  }
   0x1   :  { %v29_v0 = vld [vmem:[%s817_s0] sm:$0xff]  ;;  %v30_v1 = vld [vmem:[%s817_s0 + $0x8] sm:$0xff]  ;;  %v31_v2 = vld [vmem:[%s817_s0 + $0x10] sm:$0xff]  ;;  %576 = vset.pattern.permute.xlu0 %v610_v5  ;;  %577 = vset.pattern.permute.xlu1 %v610_v5 }
   0x2   :  { %v45_v3 = vpack.c.bf16 %v30_v1, %v29_v0  ;;  %v32_v4 = vld [vmem:[%s817_s0 + $0x18] sm:$0xff]  ;;  %v33_v8 = vld [vmem:[%s817_s0 + $0x20] sm:$0xff]  ;;  %v34_v9 = vld [vmem:[%s817_s0 + $0x28] sm:$0xff] }
   0x3   :  { %v46_v6 = vpack.c.bf16 %v32_v4, %v31_v2  ;;  %v578_v10 = vld [vmem:[%s818_s1] sm:$0xff]   ;;  %v47_v12 = vpack.c.bf16 %v34_v9, %v33_v8  ;;  %v63_v14 = vld [vmem:[%s819_s2 + $0x10] sm:$0xff]  ;;  %v62_v15 = vld [vmem:[%s819_s2 + $0x8] sm:$0xff] }
   0x4   :  { %564 = vmatprep.subr.msk.bf16.mxu0 %vm129_vm0, %v45_v3  ;;  %v143_v7 = vsel %vm129_vm0, %v45_v3, 0  ;;  %528 = vmatprep.mubr.msk.bf16.mxu0 %vm129_vm0, %v578_v10  ;;  %v61_v13 = vld [vmem:[%s819_s2] sm:$0xff]  ;;  %v64_v16 = vld [vmem:[%s819_s2 + $0x18] sm:$0xff]  ;;  %v35_v17 = vld [vmem:[%s817_s0 + $0x30] sm:$0xff] }
   0x5   :  { %513 = vmatpush3.bf16.xpose.msra.mxu0 %v143_v7  ;;  %v146_v11 = vsel %vm129_vm0, %v46_v6, 0  ;;  %71 = vperm.xlu0 %576, %v61_v13   ;;  %v36_v18 = vld [vmem:[%s817_s0 + $0x38] sm:$0xff]  ;;  %v65_v19 = vld [vmem:[%s819_s2 + $0x20] sm:$0xff]  ;;  %v66_v20 = vld [vmem:[%s819_s2 + $0x28] sm:$0xff]  ;;  %v149_v21 = vsel %vm129_vm0, %v47_v12, 0 }
   0x6   :  { %565 = vmatprep.subr.msk.bf16.mxu0 %vm129_vm0, %v46_v6  ;;  %81 = vperm.xlu1 %577, %v63_v14   ;;  %v48_v22 = vpack.c.bf16 %v36_v18, %v35_v17 }
   0x9   :  { %76 = vperm.xlu0 %576, %v62_v15  }
   0xa   :  { %86 = vperm.xlu1 %577, %v64_v16  }
   0xd   :  { %515 = vmatpush3.bf16.xpose.msra.mxu0 %v146_v11 }
   0xe   :  { %566 = vmatprep.subr.msk.bf16.mxu0 %vm129_vm0, %v47_v12 }
   0xf   :  { %13 = vsyncpa [#allocation4], 0  ;;  %91 = vperm.xlu0 %576, %v65_v19   ;;  %96 = vperm.xlu1 %577, %v66_v20   ;;  %v67_v23 = vld [vmem:[%s819_s2 + $0x30] sm:$0xff]  ;;  %v68_v24 = vld [vmem:[%s819_s2 + $0x38] sm:$0xff]  ;;  %v152_v29 = vsel %vm129_vm0, %v48_v22, 0  ;;  %vm319_vm1 = vcmask 523264  }
  0x10   :  { %v37_v25 = vld [vmem:[%s817_s0 + $0x40] sm:$0xff]  ;;  %v38_v26 = vld [vmem:[%s817_s0 + $0x48] sm:$0xff]  ;;  %v253_v31 = vld [vmem:[%s821_s4 + $0x10] sm:$0xff]  ;;  %vm612_vm2 = vmmov 0   ;;  %s613_s10 = smov [#allocation3]  }
  0x11   :  { %v251_v27 = vld [vmem:[%s821_s4] sm:$0xff]  ;;  %v252_v28 = vld [vmem:[%s821_s4 + $0x8] sm:$0xff]  ;;  %v49_v30 = vpack.c.bf16 %v38_v26, %v37_v25  ;;  %v254_v32 = vld [vmem:[%s821_s4 + $0x18] sm:$0xff]  ;;  %s462_s11 = sshll.u32 %s613_s10, 4  ;;  %s463_s11 = int_to_ptr.vmem [resolvable:$true] %s462_s11 }
  0x12   :  { %v39_v33 = vld [vmem:[%s817_s0 + $0x50] sm:$0xff]  ;;  %v40_v34 = vld [vmem:[%s817_s0 + $0x58] sm:$0xff]  ;;  %v255_v35 = vld [vmem:[%s821_s4 + $0x20] sm:$0xff]  ;;  %s586_s12 = scalar_lea.vmem %s463_s11, 16  ;;  %s590_s13 = scalar_lea.vmem %s463_s11, 32 }
  0x13   :  { %101 = vperm.xlu0 %576, %v67_v23   ;;  %106 = vperm.xlu1 %577, %v68_v24   ;;  %v256_v36 = vld [vmem:[%s821_s4 + $0x28] sm:$0xff]  ;;  %v155_v37 = vsel %vm129_vm0, %v49_v30, 0  ;;  %v50_v38 = vpack.c.bf16 %v40_v34, %v39_v33  ;;  %v257_v39 = vld [vmem:[%s821_s4 + $0x30] sm:$0xff]  ;;  %v258_v40 = vld [vmem:[%s821_s4 + $0x38] sm:$0xff]  ;;  %p587_p0 = scmp.ne.s32.totalorder %s463_s11, %s586_s12  ;;  %p591_p1 = scmp.lt.s32.totalorder %s463_s11, %s463_s11 }
  0x14   :  { %v41_v41 = vld [vmem:[%s817_s0 + $0x60] sm:$0xff]  ;;  %v42_v42 = vld [vmem:[%s817_s0 + $0x68] sm:$0xff]  ;;  %v43_v45 = vld [vmem:[%s817_s0 + $0x70] sm:$0xff]  ;;  %p592_p2 = scmp.lt.s32.totalorder %s590_s13, %s586_s12 }
  0x15   :  { %517 = vmatpush3.bf16.xpose.msra.mxu0 %v149_v21  ;;  %v158_v43 = vsel %vm129_vm0, %v50_v38, 0  ;;  %v51_v44 = vpack.c.bf16 %v42_v42, %v41_v41  ;;  %v44_v46 = vld [vmem:[%s817_s0 + $0x78] sm:$0xff]  ;;  %v579_v50 = vld [vmem:[%s818_s1 + $0x8] sm:$0xff]   ;;  %v580_v51 = vld [vmem:[%s818_s1 + $0x10] sm:$0xff]  }
  0x16   :  { %567 = vmatprep.subr.msk.bf16.mxu0 %vm129_vm0, %v48_v22  ;;  %v52_v48 = vpack.c.bf16 %v44_v46, %v43_v45  ;;  %v581_v52 = vld [vmem:[%s818_s1 + $0x18] sm:$0xff]   ;;  %v582_v53 = vld [vmem:[%s820_s3] sm:$0xff]   ;;  %v583_v26 = vld [vmem:[%s820_s3 + $0x8] sm:$0xff]   ;;  %p593_p3 = por %p592_p2, %p591_p1 }
  0x17   :  { %261 = vperm.xlu0 %576, %v251_v27   ;;  %266 = vperm.xlu1 %577, %v252_v28   ;;  %v161_v47 = vsel %vm129_vm0, %v51_v44, 0  ;;  %v584_v27 = vld [vmem:[%s820_s3 + $0x10] sm:$0xff]   ;;  %v585_v28 = vld [vmem:[%s820_s3 + $0x18] sm:$0xff]  }
  0x18   :  { %v164_v49 = vsel %vm129_vm0, %v52_v48, 0  ;;  %544 = vmatprep.mubr.msk.bf16.mxu1 %vm319_vm1, %v582_v53  ;;  %p594_p4 = pnand %p593_p3, %p587_p0 }
  0x1b   :  { %271 = vperm.xlu0 %576, %v253_v31   ;;  %276 = vperm.xlu1 %577, %v254_v32  }
  0x1d   :  { %519 = vmatpush3.bf16.xpose.msra.mxu0 %v152_v29  ;;  %v611_v29 = vmov 0.0  }
  0x1e   :  { %568 = vmatprep.subr.msk.bf16.mxu0 %vm129_vm0, %v49_v30 }
  0x1f   :  { %281 = vperm.xlu0 %576, %v255_v35   ;;  %286 = vperm.xlu1 %577, %v256_v36  }
  0x23   :  { %291 = vperm.xlu0 %576, %v257_v39   ;;  %296 = vperm.xlu1 %577, %v258_v40  }
  0x25   :  { %521 = vmatpush3.bf16.xpose.msra.mxu0 %v155_v37 }
  0x26   :  { %569 = vmatprep.subr.msk.bf16.mxu0 %vm129_vm0, %v50_v38 }
  0x2d   :  { %523 = vmatpush3.bf16.xpose.msra.mxu0 %v158_v43 }
  0x2e   :  { %570 = vmatprep.subr.msk.bf16.mxu0 %vm129_vm0, %v51_v44 }
  0x35   :  { %525 = vmatpush3.bf16.xpose.msra.mxu0 %v161_v47 }
  0x36   :  { %571 = vmatprep.subr.msk.bf16.mxu0 %vm129_vm0, %v52_v48 }
  0x3d   :  { %527 = vmatpush3.bf16.xpose.msra.mxu0 %v164_v49 }
  0x44   :  { %529 = vmatmul.mubr.msk.bf16.vlgmr.msra.gmra.mrb[0].mxu0 %vm129_vm0, %v579_v50 }
  0x45   :  { %532 = vmatprep.mubr.msk.bf16.mxu0 %vm129_vm0, %v580_v51 }
  0x4c   :  { %533 = vmatmul.mubr.msk.bf16.gmra.mrb[4].mxu0 %vm129_vm0, %v581_v52 }
  0x84   :  { %v72_v54 = vpop.permute.xlu0 %71 }
  0x85   :  { %v82_v55 = vpop.permute.xlu1 %81 }
  0x88   :  { %v77_v56 = vpop.permute.xlu0 %76 }
  0x89   :  { %v87_v57 = vpop.permute.xlu1 %86 }
  0x8e   :  { %v92_v61 = vpop.permute.xlu0 %91  ;;  %v97_v2 = vpop.permute.xlu1 %96 }
  0x92   :  { %v102_v9 = vpop.permute.xlu0 %101  ;;  %v107_v14 = vpop.permute.xlu1 %106 }
  0x96   :  { %v262_v30 = vpop.permute.xlu0 %261  ;;  %v267_v31 = vpop.permute.xlu1 %266 }
  0x9a   :  { %v272_v32 = vpop.permute.xlu0 %271  ;;  %v277_v33 = vpop.permute.xlu1 %276 }
  0x9e   :  { %v282_v37 = vpop.permute.xlu0 %281  ;;  %v287_v42 = vpop.permute.xlu1 %286 }
  0xa2   :  { %v292_v49 = vpop.permute.xlu0 %291 }
 0x117   :  { %v530_v58 = vpop.f32.mrb[0].mxu0 }
 0x118   :  { %v209_v59 = vadd.f32 %v530_v58, %v82_v55  ;;  %v200_v60 = vpop.f32.mrb[1].mxu0 }
 0x119   :  { %v201_v62 = vadd.f32 %v200_v60, %v72_v54  ;;  %v531_v63 = vpop.f32.mrb[2].mxu0  ;;  %v297_v54 = vpop.permute.xlu1 %296 }
 0x11a   :  { %v212_v0 = vadd.f32 %v531_v63, %v87_v57  ;;  %v203_v1 = vpop.f32.mrb[3].mxu0  ;;  %v233_v4 = vmax.f32 %v209_v59, 0.0 }
 0x11b   :  { %v204_v3 = vadd.f32 %v203_v1, %v77_v56  ;;  %v231_v6 = vmax.f32 %v201_v62, 0.0 }
 0x11c   :  { %v234_v5 = vmax.f32 %v212_v0, 0.0 }
 0x11d   :  { %v232_v7 = vmax.f32 %v204_v3, 0.0  ;;  %v411_v3 = vstv %s823_s6 }
 0x11e   :  { %v240_v8 = vpack.c.bf16 %v234_v5, %v233_v4 }
 0x11f   :  { %v534_v10 = vpop.f32.mrb[4].mxu0  ;;  %v239_v11 = vpack.c.bf16 %v232_v7, %v231_v6 }
 0x120   :  { %v225_v12 = vadd.f32 %v534_v10, %v102_v9  ;;  %v216_v13 = vpop.f32.mrb[5].mxu0 }
 0x121   :  { %v217_v15 = vadd.f32 %v216_v13, %v92_v61  ;;  %v535_v16 = vpop.f32.mrb[6].mxu0  ;;  %536 = vmatprep.subr.bf16.mxu1 %v239_v11 }
 0x122   :  { %v228_v17 = vadd.f32 %v535_v16, %v107_v14  ;;  %v219_v18 = vpop.f32.mrb[7].mxu0  ;;  %537 = vmatpush3.bf16.msra.mxu1 %v239_v11  ;;  %v237_v20 = vmax.f32 %v225_v12, 0.0 }
 0x123   :  { %v220_v19 = vadd.f32 %v219_v18, %v97_v2  ;;  %538 = vmatprep.subr.bf16.mxu1 %v240_v8  ;;  %v235_v22 = vmax.f32 %v217_v15, 0.0  ;;  %v409_v2 = vld [vmem:[%s822_s5] sm:$0x1] }
 0x124   :  { %v238_v21 = vmax.f32 %v228_v17, 0.0 }
 0x125   :  { %v236_v23 = vmax.f32 %v220_v19, 0.0 }
 0x126   :  { %v242_v24 = vpack.c.bf16 %v238_v21, %v237_v20  ;;  %539 = vmatpush3.bf16.msra.mxu1 %v240_v8 }
 0x127   :  { %v241_v25 = vpack.c.bf16 %v236_v23, %v235_v22 }
 0x129   :  { %540 = vmatprep.subr.bf16.mxu1 %v241_v25 }
 0x12a   :  { %541 = vmatpush3.bf16.msra.mxu1 %v241_v25 }
 0x12b   :  { %542 = vmatprep.subr.bf16.mxu1 %v242_v24 }
 0x12e   :  { %543 = vmatpush3.bf16.msra.mxu1 %v242_v24 }
 0x12f   :  { %552 = vmatprep.subr.bf16.mxu1 %v611_v29 }
 0x131   :  { %545 = vmatmul.mubr.msk.bf16.vlgmr.msra.gmra.mrb[0].mxu1 %vm319_vm1, %v583_v26 }
 0x132   :  { %548 = vmatprep.mubr.msk.bf16.mxu1 %vm319_vm1, %v584_v27 }
 0x139   :  { %549 = vmatmul.mubr.msk.bf16.gmra.mrb[4].mxu1 %vm319_vm1, %v585_v28 }
 0x13a   :  { %560 = vmatprep.mubr.msk.bf16.mxu1 %vm612_vm2, %v611_v29 }
 0x204   :  { %v546_v34 = vpop.f32.mrb[0].mxu1 }
 0x205   :  { %v375_v35 = vadd.f32 %v546_v34, %v272_v32  ;;  %v366_v36 = vpop.f32.mrb[1].mxu1 }
 0x206   :  { %v367_v38 = vadd.f32 %v366_v36, %v262_v30  ;;  %v547_v39 = vpop.f32.mrb[2].mxu1 }
 0x207   :  { %v378_v40 = vadd.f32 %v547_v39, %v277_v33  ;;  %v369_v41 = vpop.f32.mrb[3].mxu1  ;;  %v399_v44 = vmax.f32 %v375_v35, 0.0 }
 0x208   :  { %v370_v43 = vadd.f32 %v369_v41, %v267_v31  ;;  %v397_v46 = vmax.f32 %v367_v38, 0.0 }
 0x209   :  { %v400_v45 = vmax.f32 %v378_v40, 0.0 }
 0x20a   :  { %v398_v47 = vmax.f32 %v370_v43, 0.0 }
 0x20b   :  { %v406_v48 = vpack.c.bf16 %v400_v45, %v399_v44 }
 0x20c   :  { %v405_v50 = vpack.c.bf16 %v398_v47, %v397_v46  ;;  %v550_v51 = vpop.f32.mrb[4].mxu1 }
 0x20d   :  { %v391_v52 = vadd.f32 %v550_v51, %v292_v49  ;;  %v382_v53 = vpop.f32.mrb[5].mxu1 }
 0x20e   :  { %v383_v55 = vadd.f32 %v382_v53, %v282_v37  ;;  %v551_v56 = vpop.f32.mrb[6].mxu1  ;;  %553 = vmatpush3.bf16.msra.mxu1 %v405_v50 }
 0x20f   :  { %v394_v57 = vadd.f32 %v551_v56, %v297_v54  ;;  %v385_v58 = vpop.f32.mrb[7].mxu1  ;;  %554 = vmatprep.subr.bf16.mxu1 %v611_v29  ;;  %v403_v60 = vmax.f32 %v391_v52, 0.0 }
 0x210   :  { %v386_v59 = vadd.f32 %v385_v58, %v287_v42  ;;  %v401_v62 = vmax.f32 %v383_v55, 0.0 }
 0x211   :  { %v404_v61 = vmax.f32 %v394_v57, 0.0 }
 0x212   :  { %v402_v63 = vmax.f32 %v386_v59, 0.0  ;;  %555 = vmatpush3.bf16.msra.mxu1 %v406_v48 }
 0x213   :  { %v408_v0 = vpack.c.bf16 %v404_v61, %v403_v60  ;;  %556 = vmatprep.subr.bf16.mxu1 %v611_v29 }
 0x214   :  { %v407_v1 = vpack.c.bf16 %v402_v63, %v401_v62 }
 0x216   :  { %557 = vmatpush3.bf16.msra.mxu1 %v407_v1 }
 0x217   :  { %558 = vmatprep.subr.bf16.mxu1 %v611_v29 }
 0x21a   :  { %559 = vmatpush3.bf16.msra.mxu1 %v408_v0 }
 0x21d   :  { %561 = vmatmul.mubr.msk.bf16.vlgmr.msra.gmra.mrb[8].mxu1 %vm319_vm1, %v409_v2 }
 0x2f0   :  { %v449_v4 = vpop.f32.mrb[8].mxu1 }
 0x2f1   :  { %v450_v5 = vadd.f32 %v449_v4, %v411_v3  ;;  %v562_v6 = vpop.f32.mrb[9].mxu1 }
 0x2f2   :  { %v452_v7 = vpop.f32.mrb[10].mxu1 }
 0x2f3   :  { %455 = vst [vmem:[#allocation3] sm:$0x1] %v450_v5  ;;  %v563_v8 = vpop.f32.mrb[11].mxu1 }
 0x2f4   :  { %597 = shalt.err (!%p594_p4)
}
 0x2f5   :  { %s598_s6 = scalar_lea.hbm %s824_s7, 16 }
 0x2f6   :  { %p599_p5 = scmp.ne.s32.totalorder %s824_s7, %s598_s6  ;;  %p602_p6 = scmp.lt.u32.totalorder %s598_s6, %s824_s7 }
 0x2f8   :  { %p604_p7 = pnand %p602_p6, %p599_p5 }
 0x2fa   :  { %607 = shalt.err (!%p604_p7)
}
 0x2fb   :  { %465 = dma.vmem_to_hbm [thread:$0]  %s463_s11, 16, %s824_s7, [#allocation4]  }
 0x2fc   :  { %608 = dma.done.wait [#allocation4], 16  }
 0x2fd   :  { %609 = vsyncadd [#allocation4], 4294967280 }
 0x2fe   :  { %469 = vsyncpa [#allocation4], 1 }

</bundles_post_ra>
